<compile_context>
chip_gen: v7x
topology: tpu7x:2x2x1
jax: 0.10.0
libtpu: 0.0.40
codegen_flags: <defaults>
</compile_context>

<pallas_src>
import functools

import jax
import jax.numpy as jnp
from jax.experimental import pallas as pl
from jax.experimental.pallas import tpu as pltpu

EPS = 1e-5          # nn.LayerNorm default eps
HEAD_PAD = 128      # 4 (sent) + 10 (clas) outputs padded to a full 128-lane slab
N_TAPS = 5          # max kernel size among filter_sizes [1, 2, 3, 5]


def _silu(x):
    return x * jax.nn.sigmoid(x)


def cnn2head_kernel(x_ref, wfc_ref, vec_ref, wconv_ref, bcat_ref,
                    whead_ref, bhead_ref, out_ref, *, compute_dtype):
    Bt, S, E = x_ref.shape
    CF = wconv_ref.shape[-1]
    rows = Bt * S

    x = x_ref[...].reshape(rows, E)                 # (rows, E) slab

    vec = vec_ref[...]                              # (4, E): bfc / gamma / beta / pad
    bfc, gamma, beta = vec[0:1, :], vec[1:2, :], vec[2:3, :]

    # fc_input + SiLU.  Weights pre-cast to compute_dtype in the wrapper;
    # accumulation stays f32 via preferred_element_type.
    h = jnp.dot(x.astype(compute_dtype), wfc_ref[...],
                preferred_element_type=jnp.float32) + bfc
    h = _silu(h)

    # LayerNorm over E: one-pass stats (sum / sum of squares), biased variance,
    # eps inside rsqrt, affine.
    inv_e = 1.0 / E
    mean = jnp.sum(h, axis=-1, keepdims=True) * inv_e
    var = jnp.sum(h * h, axis=-1, keepdims=True) * inv_e - mean * mean
    emb = (h - mean) * jax.lax.rsqrt(var + EPS) * gamma + beta

    # Four 'same' Conv1d banks as ONE K = 5E matmul.  The five tap shifts
    # d = -2..2 (cyclic sublane roll over the flattened rows + boundary mask
    # == PyTorch zero padding; batch boundaries coincide with sequence
    # boundaries in this layout) are lane-concatenated into a (rows, 5E) slab
    # whose column order matches the tap-major (5E, 4F) packed weight.
    seq_pos = jax.lax.broadcasted_iota(jnp.int32, (rows, 1), 0) % S
    pieces = []
    for d in (-2, -1, 0, 1, 2):
        if d == 0:
            pieces.append(emb)                      # center tap: no shift / mask
        else:
            shifted = pltpu.roll(emb, shift=(-d) % rows, axis=0)  # shifted[r] = emb[r+d]
            valid = jnp.logical_and(seq_pos + d >= 0, seq_pos + d < S)
            pieces.append(shifted * valid.astype(jnp.float32))
    taps = jnp.concatenate(pieces, axis=-1).astype(compute_dtype)  # (rows, 5E)

    conved = jnp.dot(taps, wconv_ref[...],
                     preferred_element_type=jnp.float32) + bcat_ref[...]
    conved = _silu(conved)                          # (rows, 4F) == concatenated banks

    # max_pool1d over the sequence axis.
    pooled = jnp.max(conved.reshape(Bt, S, CF), axis=1)            # (Bt, 4F)

    # Fused out_sent / out_clas heads -> lane-dense (Bt, 1, 128) slab.
    head = jnp.dot(pooled.astype(compute_dtype), whead_ref[...],
                   preferred_element_type=jnp.float32) + bhead_ref[...]
    out_ref[...] = head.reshape(Bt, 1, HEAD_PAD)


def _pack_params(params, E, F, compute_dtype):
    """Pack per-module params into a few lane-dense tensors (pre-cast weights)."""
    CF = 4 * F
    # fc bias / LN gamma / LN beta stacked into one (4, E) array (row 3 unused).
    vec = jnp.concatenate(
        [params["bfc"], params["gamma"], params["beta"],
         jnp.zeros((1, E), jnp.float32)], axis=0)

    # Conv banks (k, E, F) -> (5, E, 4F) aligned by relative tap offset
    # d = j - (k-1)//2 (PyTorch padding='same'), then flattened tap-major to
    # (5E, 4F) to match the in-kernel lane concat of the tap shifts.
    wconv = jnp.zeros((N_TAPS, E, CF), jnp.float32)
    banks = (("w_conv0", 1), ("w_conv1", 2), ("w_conv2", 3), ("w_conv3", 5))
    for idx, (key, k) in enumerate(banks):
        w = params[key]
        left = (k - 1) // 2
        for j in range(k):
            d = j - left
            wconv = wconv.at[d + 2, :, idx * F:(idx + 1) * F].set(w[j])
    wconv = wconv.reshape(N_TAPS * E, CF)
    bcat = jnp.concatenate([params["b_conv0"], params["b_conv1"],
                            params["b_conv2"], params["b_conv3"]], axis=1)

    # Fused heads: (4F, 4) ++ (4F, 10), zero-padded to 128 lanes.
    whead = jnp.concatenate([params["w_sent"], params["w_clas"]], axis=1)
    whead = jnp.pad(whead, ((0, 0), (0, HEAD_PAD - whead.shape[1])))
    bhead = jnp.concatenate([params["b_sent"], params["b_clas"]], axis=1)
    bhead = jnp.pad(bhead, ((0, 0), (0, HEAD_PAD - bhead.shape[1])))

    # Matmul operands pre-cast once here (no per-step casts; halves resident
    # weight VMEM when bf16).  Biases / LN affine stay f32.
    wfc = params["wfc"].astype(compute_dtype)
    wconv = wconv.astype(compute_dtype)
    whead = whead.astype(compute_dtype)
    return wfc, vec, wconv, bcat, whead, bhead


def cnn2head_forward(x, params, *, block_b=None, compute_dtype=jnp.bfloat16):
    """CNN2HEAD_UIT forward.

    compute_dtype=jnp.bfloat16 (default) uses bf16 MXU operands with f32
    accumulation -- recommended on v6e / v7x and supported by v5e's MXU.
    Pass jnp.float32 if bit-tight (~1e-4) agreement with an f32 reference is
    required.
    """
    B, S, E = x.shape
    F = params["b_conv0"].shape[-1]

    if block_b is None:
        # Fat blocks amortize the ~0.35 us/step overhead and give the MXU a
        # real M = block_b*S.  VMEM stays tiny even at block_b=256.
        block_b = min(B, 128)
    n_blocks = pl.cdiv(B, block_b)
    if n_blocks < 2 and B > 1:
        # v7x has 2 TensorCores: a "parallel" grid axis only shards across them
        # with >= 2 grid steps.  (For large B prefer an even n_blocks so no
        # core idles on the last step.)
        block_b = pl.cdiv(B, 2)
        n_blocks = pl.cdiv(B, block_b)
    Bp = n_blocks * block_b
    if Bp != B:
        x = jnp.pad(x, ((0, Bp - B), (0, 0), (0, 0)))

    weights = _pack_params(params, E, F, compute_dtype)

    def const_spec(arr):
        nd = arr.ndim
        # Constant index_map -> fetched once; the duplicate pipeline buffer is
        # <= ~0.25 MB total here, so no pipeline_mode override is needed.
        return pl.BlockSpec(arr.shape, lambda b, _nd=nd: (0,) * _nd)

    out = pl.pallas_call(
        functools.partial(cnn2head_kernel, compute_dtype=compute_dtype),
        grid=(n_blocks,),
        in_specs=[pl.BlockSpec((block_b, S, E), lambda b: (b, 0, 0))]
                 + [const_spec(w) for w in weights],
        out_specs=pl.BlockSpec((block_b, 1, HEAD_PAD), lambda b: (b, 0, 0)),
        out_shape=jax.ShapeDtypeStruct((Bp, 1, HEAD_PAD), jnp.float32),
        compiler_params=pltpu.CompilerParams(dimension_semantics=("parallel",)),
    )(x, *weights)

    return out[:B, 0, 0:4], out[:B, 0, 4:14]


def init_params(key, E, F=96):
    ks = jax.random.split(key, 16)

    def rnd(k, shape, scale=0.05):
        return scale * jax.random.normal(k, shape, jnp.float32)

    # conv weights stored as (k, E, F)  ==  torch (F, E, k) transposed (2,1,0)
    return {
        "wfc":     rnd(ks[0], (E, E)),     "bfc":     rnd(ks[1], (1, E)),
        "gamma":   1.0 + rnd(ks[2], (1, E)), "beta":  rnd(ks[3], (1, E)),
        "w_conv0": rnd(ks[4], (1, E, F)),  "b_conv0": rnd(ks[5], (1, F)),
        "w_conv1": rnd(ks[6], (2, E, F)),  "b_conv1": rnd(ks[7], (1, F)),
        "w_conv2": rnd(ks[8], (3, E, F)),  "b_conv2": rnd(ks[9], (1, F)),
        "w_conv3": rnd(ks[10], (5, E, F)), "b_conv3": rnd(ks[11], (1, F)),
        "w_sent":  rnd(ks[12], (4 * F, 4)),  "b_sent": rnd(ks[13], (1, 4)),
        "w_clas":  rnd(ks[14], (4 * F, 10)), "b_clas": rnd(ks[15], (1, 10)),
    }


def ref_forward(x, p):
    """Pure-JAX reference mirroring the PyTorch forward (dropout = identity)."""
    h = _silu(x @ p["wfc"] + p["bfc"])
    mean = h.mean(-1, keepdims=True)
    var = ((h - mean) ** 2).mean(-1, keepdims=True)
    emb = (h - mean) / jnp.sqrt(var + EPS) * p["gamma"] + p["beta"]
    B, S, _ = emb.shape

    def conv_pool(w, b, left):
        k = w.shape[0]
        padded = jnp.pad(emb, ((0, 0), (left, k - 1 - left), (0, 0)))
        acc = jnp.zeros((B, S, w.shape[-1]), jnp.float32) + b
        for j in range(k):
            acc = acc + padded[:, j:j + S, :] @ w[j]
        return jnp.max(_silu(acc), axis=1)

    p0 = conv_pool(p["w_conv0"], p["b_conv0"], 0)
    p1 = conv_pool(p["w_conv1"], p["b_conv1"], 0)
    p2 = conv_pool(p["w_conv2"], p["b_conv2"], 1)
    p3 = conv_pool(p["w_conv3"], p["b_conv3"], 2)
    cat = jnp.concatenate([p0, p1, p2, p3], axis=1)
    return cat @ p["w_sent"] + p["b_sent"], cat @ p["w_clas"] + p["b_clas"]


if __name__ == "__main__":
    B, S, E, F = 2, 8, 32, 96
    key = jax.random.PRNGKey(0)
    kx, kp = jax.random.split(key)
    x = jax.random.normal(kx, (B, S, E), jnp.float32)
    params = init_params(kp, E, F)

    ref_sent, ref_clas = ref_forward(x, params)

    # f32-operand path: bit-tight vs. the reference.
    sent32, clas32 = jax.block_until_ready(
        cnn2head_forward(x, params, compute_dtype=jnp.float32))
    assert sent32.shape == (B, 4) and clas32.shape == (B, 10)
    assert jnp.allclose(sent32, ref_sent, atol=1e-4, rtol=1e-4)
    assert jnp.allclose(clas32, ref_clas, atol=1e-4, rtol=1e-4)

    # Default bf16-operand path (f32 accumulation): looser tolerance.
    sent, clas = jax.block_until_ready(cnn2head_forward(x, params))
    assert sent.shape == (B, 4) and clas.shape == (B, 10)
    assert jnp.allclose(sent, ref_sent, atol=5e-2, rtol=5e-2)
    assert jnp.allclose(clas, ref_clas, atol=5e-2, rtol=5e-2)
    print("KERNEL_OK")
</pallas_src>

<mosaic_0001>
module attributes {stable_mosaic.version = 11 : i64} {
  func.func @cnn2head_kernel(%arg0: i32, %arg1: memref<1x8x32xf32, #tpu.memory_space<vmem>>, %arg2: memref<32x32xf32, #tpu.memory_space<vmem>>, %arg3: memref<4x32xf32, #tpu.memory_space<vmem>>, %arg4: memref<160x384xf32, #tpu.memory_space<vmem>>, %arg5: memref<1x384xf32, #tpu.memory_space<vmem>>, %arg6: memref<384x128xf32, #tpu.memory_space<vmem>>, %arg7: memref<1x128xf32, #tpu.memory_space<vmem>>, %arg8: memref<1x1x128xf32, #tpu.memory_space<vmem>>) attributes {dimension_semantics = [#tpu.dimension_semantics<parallel>], iteration_bounds = array<i64: 2>, scalar_prefetch = 0 : i64, scratch_operands = 0 : i64, tpu.core_type = #tpu.core_type<tc>, window_params = [{transform_indices = @transform_0, window_bounds = array<i64: 1, 8, 32>}, {pipeline_mode = #tpu.pipeline_mode<synchronous>, transform_indices = @transform_1, window_bounds = array<i64: 32, 32>}, {pipeline_mode = #tpu.pipeline_mode<synchronous>, transform_indices = @transform_2, window_bounds = array<i64: 4, 32>}, {pipeline_mode = #tpu.pipeline_mode<synchronous>, transform_indices = @transform_3, window_bounds = array<i64: 160, 384>}, {pipeline_mode = #tpu.pipeline_mode<synchronous>, transform_indices = @transform_4, window_bounds = array<i64: 1, 384>}, {pipeline_mode = #tpu.pipeline_mode<synchronous>, transform_indices = @transform_5, window_bounds = array<i64: 384, 128>}, {pipeline_mode = #tpu.pipeline_mode<synchronous>, transform_indices = @transform_6, window_bounds = array<i64: 1, 128>}, {transform_indices = @transform_7, window_bounds = array<i64: 1, 1, 128>}]} {
    %c0 = arith.constant 0 : index
    %c0_0 = arith.constant 0 : index
    %c0_1 = arith.constant 0 : index
    %0 = vector.load %arg1[%c0, %c0_0, %c0_1] : memref<1x8x32xf32, #tpu.memory_space<vmem>>, vector<1x8x32xf32>
    %1 = vector.shape_cast %0 : vector<1x8x32xf32> to vector<8x32xf32>
    %c0_2 = arith.constant 0 : index
    %c0_3 = arith.constant 0 : index
    %2 = vector.load %arg3[%c0_2, %c0_3] : memref<4x32xf32, #tpu.memory_space<vmem>>, vector<4x32xf32>
    %3 = vector.extract_strided_slice %2 {offsets = [0, 0], sizes = [1, 32], strides = [1, 1]} : vector<4x32xf32> to vector<1x32xf32>
    %4 = vector.extract_strided_slice %2 {offsets = [1, 0], sizes = [1, 32], strides = [1, 1]} : vector<4x32xf32> to vector<1x32xf32>
    %5 = vector.extract_strided_slice %2 {offsets = [2, 0], sizes = [1, 32], strides = [1, 1]} : vector<4x32xf32> to vector<1x32xf32>
    %c0_4 = arith.constant 0 : index
    %c0_5 = arith.constant 0 : index
    %6 = vector.load %arg2[%c0_4, %c0_5] : memref<32x32xf32, #tpu.memory_space<vmem>>, vector<32x32xf32>
    %cst = arith.constant dense<0.000000e+00> : vector<8x32xf32>
    %7 = tpu.matmul %1, %6, %cst {dimension_numbers = #tpu.dot_dimension_numbers<[1], [0], [0], [1], [0, 0, 1, 1], [], []>} : vector<8x32xf32>, vector<32x32xf32>, vector<8x32xf32> -> vector<8x32xf32>
    %8 = vector.broadcast %3 : vector<1x32xf32> to vector<8x32xf32>
    %9 = arith.addf %7, %8 : vector<8x32xf32>
    %10 = arith.negf %9 : vector<8x32xf32>
    %11 = math.exp %10 : vector<8x32xf32>
    %cst_6 = arith.constant 1.000000e+00 : f32
    %12 = vector.broadcast %cst_6 : f32 to vector<8x32xf32>
    %13 = arith.addf %12, %11 : vector<8x32xf32>
    %14 = arith.divf %12, %13 : vector<8x32xf32>
    %15 = arith.mulf %9, %14 : vector<8x32xf32>
    %cst_7 = arith.constant dense<0.000000e+00> : vector<8xf32>
    %16 = vector.multi_reduction <add>, %15, %cst_7 [1] : vector<8x32xf32> to vector<8xf32>
    %17 = vector.shape_cast %16 : vector<8xf32> to vector<8x1xf32>
    %cst_8 = arith.constant 3.125000e-02 : f32
    %18 = vector.broadcast %cst_8 : f32 to vector<8x1xf32>
    %19 = arith.mulf %17, %18 : vector<8x1xf32>
    %20 = arith.mulf %15, %15 : vector<8x32xf32>
    %cst_9 = arith.constant dense<0.000000e+00> : vector<8xf32>
    %21 = vector.multi_reduction <add>, %20, %cst_9 [1] : vector<8x32xf32> to vector<8xf32>
    %22 = vector.shape_cast %21 : vector<8xf32> to vector<8x1xf32>
    %cst_10 = arith.constant 3.125000e-02 : f32
    %23 = vector.broadcast %cst_10 : f32 to vector<8x1xf32>
    %24 = arith.mulf %22, %23 : vector<8x1xf32>
    %25 = arith.mulf %19, %19 : vector<8x1xf32>
    %26 = arith.subf %24, %25 : vector<8x1xf32>
    %27 = vector.broadcast %19 : vector<8x1xf32> to vector<8x32xf32>
    %28 = arith.subf %15, %27 : vector<8x32xf32>
    %cst_11 = arith.constant 9.99999974E-6 : f32
    %29 = vector.broadcast %cst_11 : f32 to vector<8x1xf32>
    %30 = arith.addf %26, %29 : vector<8x1xf32>
    %31 = math.rsqrt %30 : vector<8x1xf32>
    %32 = vector.broadcast %31 : vector<8x1xf32> to vector<8x32xf32>
    %33 = arith.mulf %28, %32 : vector<8x32xf32>
    %34 = vector.broadcast %4 : vector<1x32xf32> to vector<8x32xf32>
    %35 = arith.mulf %33, %34 : vector<8x32xf32>
    %36 = vector.broadcast %5 : vector<1x32xf32> to vector<8x32xf32>
    %37 = arith.addf %35, %36 : vector<8x32xf32>
    %38 = tpu.iota {dimensions = array<i32: 0>} : vector<8x1xi32>
    %c8_i32 = arith.constant 8 : i32
    %c0_i32 = arith.constant 0 : i32
    %39 = arith.cmpi eq, %c8_i32, %c0_i32 : i32
    %c1_i32 = arith.constant 1 : i32
    %40 = arith.select %39, %c1_i32, %c8_i32 : i32
    %41 = vector.broadcast %40 : i32 to vector<8x1xi32>
    %42 = arith.remsi %38, %41 : vector<8x1xi32>
    %c0_i32_12 = arith.constant 0 : i32
    %43 = vector.broadcast %c0_i32_12 : i32 to vector<8x1xi32>
    %44 = arith.cmpi ne, %42, %43 : vector<8x1xi32>
    %c0_i32_13 = arith.constant 0 : i32
    %45 = vector.broadcast %c0_i32_13 : i32 to vector<8x1xi32>
    %46 = arith.cmpi slt, %42, %45 : vector<8x1xi32>
    %c0_i32_14 = arith.constant 0 : i32
    %47 = arith.cmpi slt, %40, %c0_i32_14 : i32
    %48 = vector.broadcast %47 : i1 to vector<8x1xi1>
    %49 = vector.broadcast %48 : vector<8x1xi1> to vector<8x1xi1>
    %50 = arith.xori %46, %49 : vector<8x1xi1>
    %51 = arith.andi %50, %44 : vector<8x1xi1>
    %52 = vector.broadcast %40 : i32 to vector<8x1xi32>
    %53 = arith.addi %42, %52 : vector<8x1xi32>
    %54 = arith.select %51, %53, %42 : vector<8x1xi1>, vector<8x1xi32>
    %c2_i32 = arith.constant 2 : i32
    %55 = tpu.dynamic_rotate %37 by %c2_i32 dim 0 : vector<8x32xf32>, i32 -> vector<8x32xf32>
    %c-2_i32 = arith.constant -2 : i32
    %56 = vector.broadcast %c-2_i32 : i32 to vector<8x1xi32>
    %57 = arith.addi %54, %56 : vector<8x1xi32>
    %c0_i32_15 = arith.constant 0 : i32
    %58 = vector.broadcast %c0_i32_15 : i32 to vector<8x1xi32>
    %59 = arith.cmpi sge, %57, %58 : vector<8x1xi32>
    %c-2_i32_16 = arith.constant -2 : i32
    %60 = vector.broadcast %c-2_i32_16 : i32 to vector<8x1xi32>
    %61 = arith.addi %54, %60 : vector<8x1xi32>
    %c8_i32_17 = arith.constant 8 : i32
    %62 = vector.broadcast %c8_i32_17 : i32 to vector<8x1xi32>
    %63 = arith.cmpi slt, %61, %62 : vector<8x1xi32>
    %64 = arith.andi %59, %63 : vector<8x1xi1>
    %65 = arith.extui %64 : vector<8x1xi1> to vector<8x1xi32>
    %66 = arith.sitofp %65 : vector<8x1xi32> to vector<8x1xf32>
    %67 = vector.broadcast %66 : vector<8x1xf32> to vector<8x32xf32>
    %68 = arith.mulf %55, %67 : vector<8x32xf32>
    %c1_i32_18 = arith.constant 1 : i32
    %69 = tpu.dynamic_rotate %37 by %c1_i32_18 dim 0 : vector<8x32xf32>, i32 -> vector<8x32xf32>
    %c-1_i32 = arith.constant -1 : i32
    %70 = vector.broadcast %c-1_i32 : i32 to vector<8x1xi32>
    %71 = arith.addi %54, %70 : vector<8x1xi32>
    %c0_i32_19 = arith.constant 0 : i32
    %72 = vector.broadcast %c0_i32_19 : i32 to vector<8x1xi32>
    %73 = arith.cmpi sge, %71, %72 : vector<8x1xi32>
    %c-1_i32_20 = arith.constant -1 : i32
    %74 = vector.broadcast %c-1_i32_20 : i32 to vector<8x1xi32>
    %75 = arith.addi %54, %74 : vector<8x1xi32>
    %c8_i32_21 = arith.constant 8 : i32
    %76 = vector.broadcast %c8_i32_21 : i32 to vector<8x1xi32>
    %77 = arith.cmpi slt, %75, %76 : vector<8x1xi32>
    %78 = arith.andi %73, %77 : vector<8x1xi1>
    %79 = arith.extui %78 : vector<8x1xi1> to vector<8x1xi32>
    %80 = arith.sitofp %79 : vector<8x1xi32> to vector<8x1xf32>
    %81 = vector.broadcast %80 : vector<8x1xf32> to vector<8x32xf32>
    %82 = arith.mulf %69, %81 : vector<8x32xf32>
    %c7_i32 = arith.constant 7 : i32
    %83 = tpu.dynamic_rotate %37 by %c7_i32 dim 0 : vector<8x32xf32>, i32 -> vector<8x32xf32>
    %c1_i32_22 = arith.constant 1 : i32
    %84 = vector.broadcast %c1_i32_22 : i32 to vector<8x1xi32>
    %85 = arith.addi %54, %84 : vector<8x1xi32>
    %c0_i32_23 = arith.constant 0 : i32
    %86 = vector.broadcast %c0_i32_23 : i32 to vector<8x1xi32>
    %87 = arith.cmpi sge, %85, %86 : vector<8x1xi32>
    %c1_i32_24 = arith.constant 1 : i32
    %88 = vector.broadcast %c1_i32_24 : i32 to vector<8x1xi32>
    %89 = arith.addi %54, %88 : vector<8x1xi32>
    %c8_i32_25 = arith.constant 8 : i32
    %90 = vector.broadcast %c8_i32_25 : i32 to vector<8x1xi32>
    %91 = arith.cmpi slt, %89, %90 : vector<8x1xi32>
    %92 = arith.andi %87, %91 : vector<8x1xi1>
    %93 = arith.extui %92 : vector<8x1xi1> to vector<8x1xi32>
    %94 = arith.sitofp %93 : vector<8x1xi32> to vector<8x1xf32>
    %95 = vector.broadcast %94 : vector<8x1xf32> to vector<8x32xf32>
    %96 = arith.mulf %83, %95 : vector<8x32xf32>
    %c6_i32 = arith.constant 6 : i32
    %97 = tpu.dynamic_rotate %37 by %c6_i32 dim 0 : vector<8x32xf32>, i32 -> vector<8x32xf32>
    %c2_i32_26 = arith.constant 2 : i32
    %98 = vector.broadcast %c2_i32_26 : i32 to vector<8x1xi32>
    %99 = arith.addi %54, %98 : vector<8x1xi32>
    %c0_i32_27 = arith.constant 0 : i32
    %100 = vector.broadcast %c0_i32_27 : i32 to vector<8x1xi32>
    %101 = arith.cmpi sge, %99, %100 : vector<8x1xi32>
    %c2_i32_28 = arith.constant 2 : i32
    %102 = vector.broadcast %c2_i32_28 : i32 to vector<8x1xi32>
    %103 = arith.addi %54, %102 : vector<8x1xi32>
    %c8_i32_29 = arith.constant 8 : i32
    %104 = vector.broadcast %c8_i32_29 : i32 to vector<8x1xi32>
    %105 = arith.cmpi slt, %103, %104 : vector<8x1xi32>
    %106 = arith.andi %101, %105 : vector<8x1xi1>
    %107 = arith.extui %106 : vector<8x1xi1> to vector<8x1xi32>
    %108 = arith.sitofp %107 : vector<8x1xi32> to vector<8x1xf32>
    %109 = vector.broadcast %108 : vector<8x1xf32> to vector<8x32xf32>
    %110 = arith.mulf %97, %109 : vector<8x32xf32>
    %111 = tpu.concatenate %68, %82, %37, %96, %110 in 1 : vector<8x32xf32>, vector<8x32xf32>, vector<8x32xf32>, vector<8x32xf32>, vector<8x32xf32> -> vector<8x160xf32>
    %c0_30 = arith.constant 0 : index
    %c0_31 = arith.constant 0 : index
    %112 = vector.load %arg4[%c0_30, %c0_31] : memref<160x384xf32, #tpu.memory_space<vmem>>, vector<160x384xf32>
    %cst_32 = arith.constant dense<0.000000e+00> : vector<8x384xf32>
    %113 = tpu.matmul %111, %112, %cst_32 {dimension_numbers = #tpu.dot_dimension_numbers<[1], [0], [0], [1], [0, 0, 1, 1], [], []>} : vector<8x160xf32>, vector<160x384xf32>, vector<8x384xf32> -> vector<8x384xf32>
    %c0_33 = arith.constant 0 : index
    %c0_34 = arith.constant 0 : index
    %114 = vector.load %arg5[%c0_33, %c0_34] : memref<1x384xf32, #tpu.memory_space<vmem>>, vector<1x384xf32>
    %115 = vector.broadcast %114 : vector<1x384xf32> to vector<8x384xf32>
    %116 = arith.addf %113, %115 : vector<8x384xf32>
    %117 = arith.negf %116 : vector<8x384xf32>
    %118 = math.exp %117 : vector<8x384xf32>
    %cst_35 = arith.constant 1.000000e+00 : f32
    %119 = vector.broadcast %cst_35 : f32 to vector<8x384xf32>
    %120 = arith.addf %119, %118 : vector<8x384xf32>
    %121 = arith.divf %119, %120 : vector<8x384xf32>
    %122 = arith.mulf %116, %121 : vector<8x384xf32>
    %123 = vector.shape_cast %122 : vector<8x384xf32> to vector<1x8x384xf32>
    %cst_36 = arith.constant dense<0xFF800000> : vector<1x384xf32>
    %124 = vector.multi_reduction <maximumf>, %123, %cst_36 [1] : vector<1x8x384xf32> to vector<1x384xf32>
    %c0_37 = arith.constant 0 : index
    %c0_38 = arith.constant 0 : index
    %125 = vector.load %arg6[%c0_37, %c0_38] : memref<384x128xf32, #tpu.memory_space<vmem>>, vector<384x128xf32>
    %cst_39 = arith.constant dense<0.000000e+00> : vector<1x128xf32>
    %126 = tpu.matmul %124, %125, %cst_39 {dimension_numbers = #tpu.dot_dimension_numbers<[1], [0], [0], [1], [0, 0, 1, 1], [], []>} : vector<1x384xf32>, vector<384x128xf32>, vector<1x128xf32> -> vector<1x128xf32>
    %c0_40 = arith.constant 0 : index
    %c0_41 = arith.constant 0 : index
    %127 = vector.load %arg7[%c0_40, %c0_41] : memref<1x128xf32, #tpu.memory_space<vmem>>, vector<1x128xf32>
    %128 = arith.addf %126, %127 : vector<1x128xf32>
    %129 = vector.shape_cast %128 : vector<1x128xf32> to vector<1x1x128xf32>
    %c0_42 = arith.constant 0 : index
    %c0_43 = arith.constant 0 : index
    %c0_44 = arith.constant 0 : index
    %130 = vector.load %arg8[%c0_42, %c0_43, %c0_44] : memref<1x1x128xf32, #tpu.memory_space<vmem>>, vector<1x1x128xf32>
    tpu.vector_store %arg8[%c0_42, %c0_43, %c0_44], %129 {strides = array<i32>} : memref<1x1x128xf32, #tpu.memory_space<vmem>>, vector<1x1x128xf32>,
    return
  }
  func.func @transform_0(%arg0: i32) -> (i32, i32, i32) {
    %c0_i32 = arith.constant 0 : i32
    %c0_i32_0 = arith.constant 0 : i32
    %c0_i32_1 = arith.constant 0 : i32
    return %arg0, %c0_i32, %c0_i32_0 : i32, i32, i32
  }
  func.func @transform_1(%arg0: i32) -> (i32, i32) {
    %c0_i32 = arith.constant 0 : i32
    %c0_i32_0 = arith.constant 0 : i32
    %c0_i32_1 = arith.constant 0 : i32
    return %c0_i32, %c0_i32_0 : i32, i32
  }
  func.func @transform_2(%arg0: i32) -> (i32, i32) {
    %c0_i32 = arith.constant 0 : i32
    %c0_i32_0 = arith.constant 0 : i32
    %c0_i32_1 = arith.constant 0 : i32
    return %c0_i32, %c0_i32_0 : i32, i32
  }
  func.func @transform_3(%arg0: i32) -> (i32, i32) {
    %c0_i32 = arith.constant 0 : i32
    %c0_i32_0 = arith.constant 0 : i32
    %c0_i32_1 = arith.constant 0 : i32
    return %c0_i32, %c0_i32_0 : i32, i32
  }
  func.func @transform_4(%arg0: i32) -> (i32, i32) {
    %c0_i32 = arith.constant 0 : i32
    %c0_i32_0 = arith.constant 0 : i32
    %c0_i32_1 = arith.constant 0 : i32
    return %c0_i32, %c0_i32_0 : i32, i32
  }
  func.func @transform_5(%arg0: i32) -> (i32, i32) {
    %c0_i32 = arith.constant 0 : i32
    %c0_i32_0 = arith.constant 0 : i32
    %c0_i32_1 = arith.constant 0 : i32
    return %c0_i32, %c0_i32_0 : i32, i32
  }
  func.func @transform_6(%arg0: i32) -> (i32, i32) {
    %c0_i32 = arith.constant 0 : i32
    %c0_i32_0 = arith.constant 0 : i32
    %c0_i32_1 = arith.constant 0 : i32
    return %c0_i32, %c0_i32_0 : i32, i32
  }
  func.func @transform_7(%arg0: i32) -> (i32, i32, i32) {
    %c0_i32 = arith.constant 0 : i32
    %c0_i32_0 = arith.constant 0 : i32
    %c0_i32_1 = arith.constant 0 : i32
    return %arg0, %c0_i32, %c0_i32_0 : i32, i32, i32
  }
}

</mosaic_0001>

<bundles_post_ra>
// kernel: tpu_custom_call.1
= control target key start
LH: loop header
LB: loop body
LE: loop exit
PB: predicated region body
PF: predicated region fallthrough
CT: control target
= control target key end

     0   :  { %s2016_s0 = inlined_call_operand.hbm [shape: f32[2,8,32], index: 0, kind: input, shape index: {}]   ;;  %s2017_s1 = inlined_call_operand.hbm [shape: f32[32,32], index: 1, kind: input, shape index: {}]   ;;  %s2018_s2 = inlined_call_operand.vmem [shape: f32[4,32], index: 2, kind: input, shape index: {}]   ;;  %s2019_s3 = inlined_call_operand.hbm [shape: f32[160,384], index: 3, kind: input, shape index: {}]   ;;  %s2020_s4 = inlined_call_operand.vmem [shape: f32[1,384], index: 4, kind: input, shape index: {}]   ;;  %s2021_s5 = inlined_call_operand.hbm [shape: f32[384,128], index: 5, kind: input, shape index: {}]   ;;  %s2022_s6 = inlined_call_operand.vmem [shape: f32[1,128], index: 6, kind: input, shape index: {}]   ;;  %s2023_s7 = inlined_call_operand.hbm [shape: f32[2,1,128], index: 7, kind: output, shape index: {}]  }
   0x1   :  { %2030 = sst [smem:[#allocation16_spill]] %s2017_s1 }
   0x2   :  { %12 = vsyncpa [#allocation3], 0 }
   0x3   :  { %14 = vsyncpa [#allocation3 + $0x1], 0 }
   0x4   :  { %15 = vsyncpa [#allocation6], 0 }
   0x5   :  { %16 = vsyncpa [#allocation9], 0 }
   0x6   :  { %17 = vsyncpa [#allocation4], 0 }
   0x7   :  { %19 = vsyncpa [#allocation4 + $0x1], 0  ;;  %s1686_s24 = smov 0   ;;  %s1688_s25 = smov 0  }
   0x8   :  { %s1690_s26 = smov 0   ;;  %s1692_s27 = smov 0  }
   0x9 LB: > { %s1707_s28 = sadd.s32 4294967295, %s1629_s27   ;;  %s1074_s29 = sadd.s32 4294967294, %s1629_s27   ;;  %s1629_s27 = sphi %s1692_s27, %s2055_s27   ;;  %s1625_s26 = sphi %s1690_s26, %s2054_s26   ;;  %s1621_s25 = sphi %s1688_s25, %s2053_s25   ;;  %s1617_s24 = sphi %s1686_s24, %s2052_s24  }
   0xa   : > { %p45_p0 = scmp.ne.s32.totalorder %s1621_s25, %s1617_s24  ;;  %p2024_p1 = scmp.eq.s32.totalorder %s1707_s28, 0 }
   0xb   : > { %p201_p3 = scmp.eq.s32.totalorder %s1074_s29, 1  ;;  %p1075_p5 = scmp.ge.s32.totalorder %s1629_s27, 1 }
   0xc   : > { %p1716_p4 = por %p2024_p1, %p45_p0  ;;  %p208_p7 = scmp.lt.s32.totalorder %s1629_s27, 3 }
   0xd   : > { %p1721_p6 = por %p201_p3, %p45_p0  ;;  %s1631_s10 = smov [#allocation5]  }
   0xe   : > { %s2031_s30 = scalar_select %p1716_p4, 1, 0 }
   0xf   : > { %s2032_s8 = scalar_select %p1721_p6, 1, 0 }
  0x10   : > { %p1726_p8 = pnand %p1075_p5, %p208_p7  ;;  %s220_s11 = sshll.u32 %s1631_s10, 4  ;;  %s1730_s11 = int_to_ptr.vmem [resolvable:$true] %s220_s11 }
  0x11   : > { %2033 = sst [smem:[#allocation15_spill]] %s2032_s8  ;;  %s1632_s13 = smov [#allocation7]  }
  0x12   : > { %s2034_s9 = scalar_select %p1726_p8, 1, 0 }
  0x13   : > { %p1352_p9 = pneg %p1726_p8  ;;  %s236_s14 = sshll.u32 %s1632_s13, 4  ;;  %s1741_s14 = int_to_ptr.vmem [resolvable:$true] %s236_s14 }
  0x14   : > { %s2036_s1 = sld [smem:[#allocation16_spill]] }
  0x15   : > { %p1737_p11 = pnand %p1352_p9, %p2024_p1 }
  0x17   : > { %p1751_p13 = pneg %p1737_p11 }
  0x1a   : > { %s1441_s17 = scalar_lea.hbm %s2036_s1, 512 }
  0x1b   : > { %p1442_p12 = scmp.ne.s32.totalorder %s2036_s1, %s1441_s17  ;;  %p1448_p5 = scmp.lt.u32.totalorder %s1441_s17, %s2036_s1 }
  0x1d   : > { %p1444_p0 = pnand %p1751_p13, %p1442_p12 }
  0x1f   : > { %p1445_p3 = pneg %p1444_p0 }
  0x21   : > { %p1450_p7 = pnand %p1448_p5, %p1445_p3 }
  0x23   : > { %1453 = shalt.err (!%p1450_p7)
}
  0x24   : > { %s1454_s23 = scalar_lea.vmem %s1730_s11, 512  ;;  %p1462_p2 = scmp.lt.s32.totalorder %s1730_s11, %s1730_s11 }
  0x25   : > { %p1455_p9 = scmp.ne.s32.totalorder %s1730_s11, %s1454_s23  ;;  %p1463_p6 = scmp.lt.s32.totalorder %s1454_s23, %s1454_s23 }
  0x27   : > { %p1457_p10 = pnand %p1455_p9, %p1751_p13  ;;  %p1464_p12 = por %p1463_p6, %p1462_p2 }
  0x29   : > { %p1458_p1 = pneg %p1457_p10 }
  0x2b   : > { %p1465_p0 = pnand %p1464_p12, %p1458_p1 }
  0x2d   : > { %1468 = shalt.err (!%p1465_p0)
}
  0x2e   : > { %s2025_s29 = smov 128   ;;  %s2026_s10 = smov 8  }
  0x2f   : > { %1355 = dma.hbm_to_vmem [thread:$0]  (!%p1737_p11), %s2036_s1, 512, %s1730_s11, [#allocation6], %s2025_s29, %s2025_s29, %s2026_s10  }
  0x30   : > { %s1469_s18 = scalar_lea.hbm %s2019_s3, 7680 }
  0x31   : > { %p1470_p1 = scmp.ne.s32.totalorder %s2019_s3, %s1469_s18  ;;  %p1476_p10 = scmp.lt.u32.totalorder %s1469_s18, %s2019_s3 }
  0x33   : > { %p1472_p2 = pnand %p1470_p1, %p1751_p13 }
  0x35   : > { %p1473_p6 = pneg %p1472_p2 }
  0x37   : > { %p1478_p3 = pnand %p1476_p10, %p1473_p6 }
  0x39   : > { %1481 = shalt.err (!%p1478_p3)
}
  0x3a   : > { %s1482_s11 = scalar_lea.vmem %s1741_s14, 7680  ;;  %p1490_p12 = scmp.lt.s32.totalorder %s1741_s14, %s1741_s14 }
  0x3b   : > { %p1483_p5 = scmp.ne.s32.totalorder %s1741_s14, %s1482_s11  ;;  %p1491_p0 = scmp.lt.s32.totalorder %s1482_s11, %s1482_s11 }
  0x3d   : > { %p1485_p7 = pnand %p1483_p5, %p1751_p13  ;;  %p1492_p1 = por %p1491_p0, %p1490_p12 }
  0x3f   : > { %p1486_p9 = pneg %p1485_p7 }
  0x41   : > { %p1493_p2 = pnand %p1492_p1, %p1486_p9 }
  0x43   : > { %1496 = shalt.err (!%p1493_p2)
}
  0x44   : > { %s1635_s13 = smov 384   ;;  %s1636_s15 = smov 24  }
  0x45   : > { %1358 = dma.hbm_to_vmem [thread:$0]  (!%p1737_p11), %s2019_s3, 7680, %s1741_s14, [#allocation6], %s1635_s13, %s1635_s13, %s1636_s15  }
  0x46   : > { %s1637_s18 = smov [#allocation8]   ;;  %s1799_s21 = sadd.s32 1, %s1629_s27  }
  0x47   : > { %s252_s19 = sshll.u32 %s1637_s18, 4  ;;  %s1497_s11 = scalar_lea.hbm %s2021_s5, 6144  ;;  %s253_s19 = int_to_ptr.vmem [resolvable:$true] %s252_s19 }
  0x48   : > { %p1498_p6 = scmp.ne.s32.totalorder %s2021_s5, %s1497_s11  ;;  %p1504_p5 = scmp.lt.u32.totalorder %s1497_s11, %s2021_s5 }
  0x4a   : > { %p1500_p10 = pnand %p1498_p6, %p1751_p13 }
  0x4c   : > { %p1501_p3 = pneg %p1500_p10 }
  0x4e   : > { %p1506_p7 = pnand %p1504_p5, %p1501_p3 }
  0x50   : > { %1509 = shalt.err (!%p1506_p7)
}
  0x51   : > { %s1510_s14 = scalar_lea.vmem %s253_s19, 6144  ;;  %p1518_p1 = scmp.lt.s32.totalorder %s253_s19, %s253_s19 }
  0x52   : > { %p1511_p9 = scmp.ne.s32.totalorder %s253_s19, %s1510_s14  ;;  %p1519_p2 = scmp.lt.s32.totalorder %s1510_s14, %s1510_s14 }
  0x54   : > { %p1513_p12 = pnand %p1511_p9, %p1751_p13  ;;  %p1520_p4 = por %p1519_p2, %p1518_p1 }
  0x56   : > { %p1514_p0 = pneg %p1513_p12 }
  0x58   : > { %p1521_p8 = pnand %p1520_p4, %p1514_p0 }
  0x5a   : > { %1524 = shalt.err (!%p1521_p8)
}
  0x5b   : > { %s2038_s29 = smov 8   ;;  %s2039_s10 = smov 128  }
  0x5c   : > { %1361 = dma.hbm_to_vmem [thread:$0]  (!%p1737_p11), %s2021_s5, 6144, %s253_s19, [#allocation9], %s2039_s10, %s2039_s10, %s2038_s29  }
  0x5d   : > { %s29_s20 = ssub.s32 %s1629_s27, %s1799_s21  ;;  %s32_s12 = sadd.s32 1, %s1625_s26 }
  0x5e   : > { %p30_p4 = scmp.eq.s32.totalorder %s29_s20, 0  ;;  %p39_p8 = scmp.ne.s32.totalorder %s1625_s26, %s1621_s25 }
  0x5f   : > { %p40_p13 = scmp.eq.s32.totalorder %s1629_s27, 0  ;;  %p1373_p6 = scmp.lt.s32.totalorder %s1629_s27, 2 }
  0x60   : > { %s1830_s13 = scalar_select %p30_p4, %s1625_s26, %s32_s12  }
  0x61   : > { %p41_p10 = por %p40_p13, %p39_p8  ;;  %p2040_p3 = scmp.eq.s32.totalorder %s1707_s28, 1 }
  0x62   : > { %s269_s16 = sand.u32 1, %s1625_s26   ;;  %s1081_s17 = sshll.u32 %s1629_s27, 7 }
  0x63   : > { %p1834_p5 = por %p2040_p3, %p39_p8  ;;  %s1080_s18 = sshll.u32 %s269_s16, 3 }
  0x64   : > { %s1843_s19 = scalar_lea.hbm %s2016_s0, %s1081_s17  ;;  %s273_s11 = scalar_lea.vmem [#allocation2], %s1080_s18 }
  0x65   : > { %s280_s14 = sshll.u32 %s273_s11, 4  ;;  %p1845_p11 = pnand %p1373_p6, %p41_p10  ;;  %s1849_s14 = int_to_ptr.vmem [resolvable:$true] %s280_s14 }
  0x66   : > { %s270_s10 = scalar_lea.sflag [#allocation3], %s269_s16  ;;  %s1525_s1 = scalar_lea.hbm %s1843_s19, 128 }
  0x67   : > { %p1526_p7 = scmp.ne.s32.totalorder %s1843_s19, %s1525_s1  ;;  %p1527_p9 = pneg %p1845_p11 }
  0x68   : > { %s1530_s12 = scalar_lea.hbm %s2016_s0, 256  ;;  %p1531_p1 = scmp.lt.u32.totalorder %s1843_s19, %s2016_s0 }
  0x69   : > { %p1528_p12 = pnand %p1527_p9, %p1526_p7  ;;  %p1532_p2 = scmp.lt.u32.totalorder %s1530_s12, %s1525_s1 }
  0x6a   : > { %p1534_p8 = scmp.lt.u32.totalorder %s1525_s1, %s1843_s19 }
  0x6b   : > { %p1529_p0 = pneg %p1528_p12  ;;  %p1533_p4 = por %p1532_p2, %p1531_p1 }
  0x6d   : > { %p1535_p13 = por %p1534_p8, %p1533_p4 }
  0x6f   : > { %p1536_p6 = pnand %p1535_p13, %p1529_p0 }
  0x71   : > { %1539 = shalt.err (!%p1536_p6)
}
  0x72   : > { %s1540_s16 = scalar_lea.vmem %s1849_s14, 128  ;;  %s1638_s22 = smov [#allocation2]  }
  0x73   : > { %p1541_p10 = scmp.ne.s32.totalorder %s1849_s14, %s1540_s16  ;;  %s1545_s23 = sshll.u32 %s1638_s22, 4  ;;  %s1546_s23 = int_to_ptr.vmem [resolvable:$false] %s1545_s23 }
  0x74   : > { %s1547_s11 = scalar_lea.vmem %s1546_s23, 256  ;;  %p1548_p12 = scmp.lt.s32.totalorder %s1849_s14, %s1546_s23 }
  0x75   : > { %p1543_p3 = pnand %p1541_p10, %p1527_p9  ;;  %p1549_p1 = scmp.lt.s32.totalorder %s1547_s11, %s1540_s16 }
  0x77   : > { %p1544_p7 = pneg %p1543_p3  ;;  %p1550_p2 = por %p1549_p1, %p1548_p12 }
  0x79   : > { %p1551_p4 = pnand %p1550_p2, %p1544_p7 }
  0x7b   : > { %1554 = shalt.err (!%p1551_p4)
}
  0x7c   : > { %1365 = dma.hbm_to_vmem [thread:$0]  (!%p1845_p11), %s1843_s19, 128, %s1849_s14, %s270_s10  }
  0x7d   : > { %p2043_p0 = scmp.ne.s32.totalorder %s2034_s9, 0 }
  0x7e   : > { %s1879_s1 = sand.u32 (!%p2043_p0), 1, %s1621_s25   ;;  %p2044_p9 = scmp.ne.s32.totalorder (!%p2043_p0), %s2031_s30, 0 }
  0x7f   : > { %289 = sbr.rel (%p2043_p0) target bundleno = 1179 (0x49b), region = 48  ;;  %s1083_s8 = sshll.u32 (!%p2043_p0), %s1879_s1, 3 }
  0x80   : > { %s292_s20 = scalar_lea.sflag (!%p2043_p0), [#allocation3], %s1879_s1  ;;  %s295_s12 = scalar_lea.vmem (!%p2043_p0), [#allocation2], %s1083_s8 }
  0x86   : > { %1600 = dma.done.wait (%p2044_p9), %s292_s20, 128  }
  0x87   : > { %1602 = vsyncadd (%p2044_p9), %s292_s20, 4294967168  ;;  %p2045_p8 = scmp.eq.s32.totalorder %s1707_s28, 0 }
  0x89   : > { %1604 = dma.done.wait (%p2045_p8), [#allocation6], 8192   ;;  %p2046_p11 = pmov %p2045_p8 }
  0x8a   : > { %p2047_p13 = pmov %p2045_p8 }
  0x8b   : > { %1606 = vsyncadd (%p2046_p11), [#allocation6], 4294959104 }
  0x8c   : > { %1608 = dma.done.wait (%p2047_p13), [#allocation9], 6144   ;;  %p2048_p6 = pmov %p2045_p8 }
  0x8d   : > { %v1639_v0 = vmov 0.0|0.0   ;;  %vm1640_vm0 = vmmov 0   ;;  %v1641_v1 = vmov 0.0   ;;  %v339_v2 = vld [vmem:[#allocation5] sm:$0xff]  ;;  %v340_v3 = vld [vmem:[#allocation5 + $0x8] sm:$0xff]  ;;  %v341_v4 = vld [vmem:[#allocation5 + $0x10] sm:$0xff]  ;;  %v343_v9 = vlaneseq }
  0x8e   : > { %1610 = vsyncadd (%p2048_p6), [#allocation9], 4294961152  ;;  %1204 = vmatprep.subr.bf16.mxu0 %v1639_v0  ;;  %1166 = vmatprep.mubr.msk.f32.mxu0 %vm1640_vm0, %v1641_v1  ;;  %v1205_v5 = vpack.c.bf16 %v340_v3, %v339_v2  ;;  %v342_v6 = vld [vmem:[#allocation5 + $0x18] sm:$0xff]  ;;  %vm347_vm1 = vcmask 261120   ;;  %v1907_v12 = vld [vmem:[%s2018_s2] sm:$0xf] }
  0x8f   : > { %v1208_v7 = vpack.c.bf16 %v342_v6, %v341_v4  ;;  %v337_v8 = vld [vmem:[%s295_s12] sm:$0xff]  ;;  %v1901_v10 = vshrl.u32 %v343_v9, 7  ;;  %v517_v25 = vld [vmem:[#allocation7 + $0x8] sm:$0xff]  ;;  %v520_v26 = vld [vmem:[#allocation7 + $0x20] sm:$0xff]  ;;  %s1642_s19 = smov 96   ;;  %s1643_s14 = smov 32  }
  0x90   : > { %1206 = vmatpush3.bf16.msra.mxu0 %v1205_v5  ;;  %v516_v27 = vld [vmem:[#allocation7] sm:$0xff]  ;;  %v1210_v28 = vpack.c.bf16 %v520_v26, %v517_v25  ;;  %v519_v29 = vld [vmem:[#allocation7 + $0x18] sm:$0xff]  ;;  %v518_v30 = vld [vmem:[#allocation7 + $0x10] sm:$0xff]  ;;  %s1644_s29 = smov 64   ;;  %vm512_vm6 = vcmask 523264   ;;  %vm514_vm7 = vcmask 785408  }
  0x91   : > { %1207 = vmatprep.subr.bf16.mxu0 %v1639_v0  ;;  %v345_v11 = vsub.s32 0, %v1901_v10  ;;  %v521_v31 = vld [vmem:[#allocation7 + $0x28] sm:$0xff]  ;;  %v1212_v32 = vpack.c.bf16 %v519_v29, %v516_v27  ;;  %v523_v34 = vld [vmem:[#allocation7 + $0x38] sm:$0xff]  ;;  %v526_v35 = vld [vmem:[#allocation7 + $0x50] sm:$0xff]  ;;  %s1098_s22 = sshll.u32 %s1707_s28, 4  ;;  %s336_s23 = scalar_lea.vmem [#allocation10], %s1879_s1 }
  0x92   : > { %v1251_v33 = vpack.c.bf16 %v521_v31, %v518_v30  ;;  %v522_v36 = vld [vmem:[#allocation7 + $0x30] sm:$0xff]  ;;  %1211 = vmatprep.subr.bf16.mxu1 %v1210_v28  ;;  %v1214_v37 = vpack.c.bf16 %v526_v35, %v523_v34  ;;  %v525_v38 = vld [vmem:[#allocation7 + $0x48] sm:$0xff]  ;;  %v524_v39 = vld [vmem:[#allocation7 + $0x40] sm:$0xff]  ;;  %s979_s11 = sshll.u32 %s336_s23, 4  ;;  %s1972_s12 = scalar_lea.hbm %s2023_s7, %s1098_s22  ;;  %s1974_s11 = int_to_ptr.vmem [resolvable:$true] %s979_s11 }
  0x93   : > { %v346_v13 = vrot.slane %v1907_v12, %v345_v11  ;;  %v527_v40 = vld [vmem:[#allocation7 + $0x58] sm:$0xff]  ;;  %1213 = vmatpush1.bf16.msra.mxu1 %v1212_v32  ;;  %v1216_v41 = vpack.c.bf16 %v525_v38, %v522_v36  ;;  %v529_v43 = vld [vmem:[#allocation7 + $0x68] sm:$0xff]  ;;  %v532_v44 = vld [vmem:[#allocation7 + $0x80] sm:$0xff]  ;;  %s967_s30 = scalar_lea.sflag [#allocation4], %s1879_s1  ;;  %s1555_s9 = scalar_lea.vmem %s1974_s11, 16 }
  0x94   : > { %1209 = vmatpush3.bf16.msra.mxu0 %v1208_v7  ;;  %v1254_v42 = vpack.c.bf16 %v527_v40, %v524_v39  ;;  %v528_v45 = vld [vmem:[#allocation7 + $0x60] sm:$0xff]  ;;  %1215 = vmatprep.subr.bf16.mxu1 %v1214_v37  ;;  %v1218_v46 = vpack.c.bf16 %v532_v44, %v529_v43  ;;  %v531_v47 = vld [vmem:[#allocation7 + $0x78] sm:$0xff]  ;;  %v530_v48 = vld [vmem:[#allocation7 + $0x70] sm:$0xff]  ;;  %p1556_p10 = scmp.ne.s32.totalorder %s1974_s11, %s1555_s9  ;;  %s1645_s28 = smov [#allocation10]  }
  0x95   : > { %1250 = vmatprep.subr.bf16.mxu0 %v1639_v0  ;;  %v533_v49 = vld [vmem:[#allocation7 + $0x88] sm:$0xff]  ;;  %v535_v50 = vld [vmem:[#allocation7 + $0x98] sm:$0xff]  ;;  %v538_v51 = vld [vmem:[#allocation7 + $0xb0] sm:$0xff]  ;;  %v1220_v52 = vpack.c.bf16 %v531_v47, %v528_v45 }
  0x96   : > { %v1257_v53 = vpack.c.bf16 %v533_v49, %v530_v48  ;;  %v534_v54 = vld [vmem:[#allocation7 + $0x90] sm:$0xff]  ;;  %v1222_v55 = vpack.c.bf16 %v538_v51, %v535_v50  ;;  %v537_v56 = vld [vmem:[#allocation7 + $0xa8] sm:$0xff]  ;;  %v536_v57 = vld [vmem:[#allocation7 + $0xa0] sm:$0xff]  ;;  %p1557_p3 = pnand %p1556_p10, %p1834_p5 }
  0x97   : > { %1167 = vmatmul.mubr.msk.f32.vlgmr.msra.gmra.mrb[0].mxu0 %vm347_vm1, %v337_v8  ;;  %1217 = vmatpush1.bf16.msra.mxu1 %v1216_v41  ;;  %v539_v58 = vld [vmem:[#allocation7 + $0xb8] sm:$0xff]  ;;  %v541_v59 = vld [vmem:[#allocation7 + $0xc8] sm:$0xff]  ;;  %v544_v60 = vld [vmem:[#allocation7 + $0xe0] sm:$0xff]  ;;  %v1224_v61 = vpack.c.bf16 %v537_v56, %v534_v54  ;;  %v459_v56 = vand.u32 7, %v1901_v10 }
  0x98   : > { %1252 = vmatpush1.bf16.msra.mxu0 %v1251_v33  ;;  %1219 = vmatprep.subr.bf16.mxu1 %v1218_v46  ;;  %v1260_v62 = vpack.c.bf16 %v539_v58, %v536_v57  ;;  %v540_v63 = vld [vmem:[#allocation7 + $0xc0] sm:$0xff]  ;;  %v1226_v2 = vpack.c.bf16 %v544_v60, %v541_v59  ;;  %v543_v3 = vld [vmem:[#allocation7 + $0xd8] sm:$0xff]  ;;  %v542_v4 = vld [vmem:[#allocation7 + $0xd0] sm:$0xff]  ;;  %v450_v57 = vsub.s32 2, %v1901_v10  ;;  %p1558_p7 = pneg %p1557_p3 }
  0x99   : > { %1253 = vmatprep.subr.bf16.mxu0 %v1639_v0  ;;  %v545_v5 = vld [vmem:[#allocation7 + $0xe8] sm:$0xff]  ;;  %v547_v6 = vld [vmem:[#allocation7 + $0xf8] sm:$0xff]  ;;  %v550_v7 = vld [vmem:[#allocation7 + $0x110] sm:$0xff]  ;;  %v1228_v8 = vpack.c.bf16 %v543_v3, %v540_v63  ;;  %v492_v59 = vadd.s32 2, %v459_v56  ;;  %v484_v60 = vadd.s32 1, %v459_v56  ;;  %v468_v3 = vadd.s32 4294967294, %v459_v56 }
  0x9a   : > { %v1263_v9 = vpack.c.bf16 %v545_v5, %v542_v4  ;;  %v555_v25 = vld [vmem:[#allocation7 + $0x138] sm:$0xff]  ;;  %v554_v26 = vld [vmem:[#allocation7 + $0x130] sm:$0xff]  ;;  %v557_v27 = vld [vmem:[#allocation7 + $0x148] sm:$0xff] }
  0x9b   : > { %1221 = vmatpush1.bf16.msra.mxu1 %v1220_v52  ;;  %v559_v28 = vld [vmem:[#allocation7 + $0x158] sm:$0xff]  ;;  %v562_v29 = vld [vmem:[#allocation7 + $0x170] sm:$0xff]  ;;  %v1269_v31 = vpack.c.bf16 %v557_v27, %v554_v26  ;;  %v561_v34 = vld [vmem:[#allocation7 + $0x168] sm:$0xff]  ;;  %vm494_vm2 = vcmp.lt.s32.totalorder %v492_v59, 8  ;;  %vm486_vm3 = vcmp.lt.s32.totalorder %v484_v60, 8  ;;  %vm469_vm5 = vcmp.ge.s32.totalorder %v468_v3, 0 }
  0x9c   : > { %1255 = vmatpush1.bf16.msra.mxu0 %v1254_v42  ;;  %1223 = vmatprep.subr.bf16.mxu1 %v1222_v55  ;;  %v558_v32 = vld [vmem:[#allocation7 + $0x150] sm:$0xff]  ;;  %v1238_v33 = vpack.c.bf16 %v562_v29, %v559_v28  ;;  %v560_v35 = vld [vmem:[#allocation7 + $0x160] sm:$0xff]  ;;  %v563_v36 = vld [vmem:[#allocation7 + $0x178] sm:$0xff]  ;;  %v445_v55 = vsub.s32 1, %v1901_v10 }
  0x9d   : > { %1256 = vmatprep.subr.bf16.mxu0 %v1639_v0  ;;  %v565_v37 = vld [vmem:[#allocation7 + $0x188] sm:$0xff]  ;;  %v568_v38 = vld [vmem:[#allocation7 + $0x1a0] sm:$0xff]  ;;  %v1240_v39 = vpack.c.bf16 %v561_v34, %v558_v32  ;;  %v1272_v40 = vpack.c.bf16 %v563_v36, %v560_v35  ;;  %v567_v43 = vld [vmem:[#allocation7 + $0x198] sm:$0xff] }
  0x9e   : > { %v564_v41 = vld [vmem:[#allocation7 + $0x180] sm:$0xff]  ;;  %v1242_v42 = vpack.c.bf16 %v568_v38, %v565_v37  ;;  %v566_v44 = vld [vmem:[#allocation7 + $0x190] sm:$0xff]  ;;  %v569_v45 = vld [vmem:[#allocation7 + $0x1a8] sm:$0xff]  ;;  %v446_v58 = vrot.slane %v1907_v12, %v445_v55 }
  0x9f   : > { %1225 = vmatpush1.bf16.msra.mxu1 %v1224_v61  ;;  %v1244_v46 = vpack.c.bf16 %v567_v43, %v564_v41  ;;  %v1275_v47 = vpack.c.bf16 %v569_v45, %v566_v44  ;;  %v571_v61 = vld [vmem:[#allocation7 + $0x1b8] sm:$0xff]  ;;  %v570_v5 = vld [vmem:[#allocation7 + $0x1b0] sm:$0xff]  ;;  %v808_v36 = vld [vmem:[#allocation8 + $0x100] sm:$0xff] }
  0xa0   : > { %1258 = vmatpush1.bf16.msra.mxu0 %v1257_v53  ;;  %1227 = vmatprep.subr.bf16.mxu1 %v1226_v2  ;;  %v476_v2 = vadd.s32 4294967295, %v459_v56  ;;  %v809_v37 = vld [vmem:[#allocation8 + $0x108] sm:$0xff]  ;;  %v810_v45 = vld [vmem:[#allocation8 + $0x110] sm:$0xff]  ;;  %v815_v3 = vld [vmem:[#allocation8 + $0x138] sm:$0xff] }
  0xa1   : > { %1259 = vmatprep.subr.bf16.mxu0 %v1639_v0  ;;  %v1313_v38 = vpack.c.bf16 %v809_v37, %v808_v36  ;;  %v777_v43 = vld [vmem:[#allocation8 + $0x8] sm:$0xff]  ;;  %v788_v37 = vld [vmem:[#allocation8 + $0x60] sm:$0xff] }
  0xa2   : > { %vm477_vm4 = vcmp.ge.s32.totalorder %v476_v2, 0  ;;  %v797_v59 = vld [vmem:[#allocation8 + $0xa8] sm:$0xff]  ;;  %v814_v2 = vld [vmem:[#allocation8 + $0x130] sm:$0xff] }
  0xa3   : > { %1229 = vmatpush1.bf16.msra.mxu1 %v1228_v8 }
  0xa4   : > { %1261 = vmatpush1.bf16.msra.mxu0 %v1260_v62  ;;  %v574_v62 = vld [vmem:[#allocation7 + $0x1d0] sm:$0xff] }
  0xa5   : > { %1262 = vmatprep.subr.bf16.mxu0 %v1639_v0  ;;  %v1246_v4 = vpack.c.bf16 %v574_v62, %v571_v61  ;;  %v780_v61 = vld [vmem:[#allocation8 + $0x20] sm:$0xff]  ;;  %v781_v62 = vld [vmem:[#allocation8 + $0x28] sm:$0xff] }
  0xa8   : > { %1264 = vmatpush1.bf16.msra.mxu0 %v1263_v9 }
  0xa9   : > { %1265 = vmatprep.subr.bf16.mxu0 %v1639_v0 }
 0x16a   : > { %v417_v14 = vpop.f32.mrb[0].mxu0 }
 0x16b   : > { %v418_v15 = vadd.f32 %v417_v14, %v346_v13  ;;  %v1168_v16 = vpop.f32.mrb[1].mxu0  ;;  %v546_v13 = vld [vmem:[#allocation7 + $0xf0] sm:$0xff]  ;;  %v1230_v14 = vpack.c.bf16 %v550_v7, %v547_v6  ;;  %v573_v6 = vld [vmem:[#allocation7 + $0x1c8] sm:$0xff]  ;;  %v572_v7 = vld [vmem:[#allocation7 + $0x1c0] sm:$0xff] }
 0x16c   : > { %v548_v16 = vld [vmem:[#allocation7 + $0x100] sm:$0xff]  ;;  %v1248_v9 = vpack.c.bf16 %v573_v6, %v570_v5  ;;  %v798_v5 = vld [vmem:[#allocation8 + $0xb0] sm:$0xff]  ;;  %v799_v6 = vld [vmem:[#allocation8 + $0xb8] sm:$0xff] }
 0x16d   : > { %v1088_v17 = vmul.f32 -1.442695, %v418_v15  ;;  %1231 = vmatprep.subr.bf16.mxu1 %v1230_v14  ;;  %v451_v14 = vrot.slane %v1907_v12, %v450_v57  ;;  %v1089_v12 = vsel %vm469_vm5, 1.0, %v1641_v1 }
 0x16f   : > { %1423 = vpow2.f32 %v1088_v17  ;;  %v551_v17 = vld [vmem:[#allocation7 + $0x118] sm:$0xff] }
 0x179   : > { %v1424_v18 = vpop.eup %1423 }
 0x17a   : > { %v424_v19 = vadd.f32 1.0, %v1424_v18  ;;  %v553_v18 = vld [vmem:[#allocation7 + $0x128] sm:$0xff] }
 0x17c   : > { %1425 = vrcp.f32 %v424_v19  ;;  %v556_v19 = vld [vmem:[#allocation7 + $0x140] sm:$0xff] }
 0x186   : > { %v1426_v20 = vpop.eup %1425 }
 0x187   : > { %v1912_v21 = vmul.f32 %v1426_v20, %v418_v15  ;;  %v549_v15 = vld [vmem:[#allocation7 + $0x108] sm:$0xff] }
 0x188   : > { %v1232_v20 = vpack.c.bf16 %v549_v15, %v546_v13  ;;  %v575_v13 = vld [vmem:[#allocation7 + $0x1d8] sm:$0xff] }
 0x189   : > { %v428_v22 = vsel %vm347_vm1, %v1912_v21, 0.0  ;;  %v432_v23 = vmul.f32 %v1912_v21, %v1912_v21 }
 0x18a   : > { %429 = vadd.xlane.f32.xlu0 %v428_v22  ;;  %v1266_v22 = vpack.c.bf16 %v551_v17, %v548_v16  ;;  %1233 = vmatpush1.bf16.msra.mxu1 %v1232_v20  ;;  %v1278_v16 = vpack.c.bf16 %v575_v13, %v572_v7  ;;  %v1090_v20 = vsel %vm477_vm4, 1.0, %v1641_v1  ;;  %v1292_v7 = vpack.c.bf16 %v799_v6, %v798_v5 }
 0x18b   : > { %v433_v24 = vsel %vm347_vm1, %v432_v23, 0.0  ;;  %v552_v23 = vld [vmem:[#allocation7 + $0x120] sm:$0xff] }
 0x18c   : > { %1267 = vmatpush1.bf16.msra.mxu0 %v1266_v22  ;;  %v1236_v30 = vpack.c.bf16 %v555_v25, %v552_v23 }
 0x18d   : > { %1268 = vmatprep.subr.bf16.mxu0 %v1639_v0 }
 0x18e   : > { %434 = vadd.xlane.f32.xlu0 %v433_v24  ;;  %v1234_v24 = vpack.c.bf16 %v556_v19, %v553_v18  ;;  %v1092_v18 = vsel %vm494_vm2, 1.0, %v1641_v1  ;;  %v1091_v19 = vsel %vm486_vm3, 1.0, %v1641_v1 }
 0x190   : > { %1235 = vmatprep.subr.bf16.mxu1 %v1234_v24  ;;  %1270 = vmatpush1.bf16.msra.mxu0 %v1269_v31 }
 0x191   : > { %1237 = vmatpush1.bf16.msra.mxu1 %v1236_v30  ;;  %1271 = vmatprep.subr.bf16.mxu0 %v1639_v0 }
 0x192   : > { %1239 = vmatprep.subr.bf16.mxu1 %v1238_v33 }
 0x194   : > { %1273 = vmatpush1.bf16.msra.mxu0 %v1272_v40  ;;  %v793_v40 = vld [vmem:[#allocation8 + $0x88] sm:$0xff] }
 0x195   : > { %1241 = vmatpush1.bf16.msra.mxu1 %v1240_v39  ;;  %1274 = vmatprep.subr.bf16.mxu0 %v1639_v0  ;;  %v792_v39 = vld [vmem:[#allocation8 + $0x80] sm:$0xff] }
 0x196   : > { %1243 = vmatprep.subr.bf16.mxu1 %v1242_v42  ;;  %v1280_v41 = vpack.c.bf16 %v793_v40, %v792_v39  ;;  %v776_v42 = vld [vmem:[#allocation8] sm:$0xff]  ;;  %v822_v40 = vld [vmem:[#allocation8 + $0x170] sm:$0xff] }
 0x197   : > { %v1282_v44 = vpack.c.bf16 %v777_v43, %v776_v42  ;;  %v806_v43 = vld [vmem:[#allocation8 + $0xf0] sm:$0xff] }
 0x198   : > { %1276 = vmatpush1.bf16.msra.mxu0 %v1275_v47 }
 0x199   : > { %1245 = vmatpush1.bf16.msra.mxu1 %v1244_v46  ;;  %1277 = vmatprep.subr.bf16.mxu0 %v1639_v0  ;;  %v811_v46 = vld [vmem:[#allocation8 + $0x118] sm:$0xff] }
 0x19a   : > { %1247 = vmatprep.subr.bf16.mxu1 %v1246_v4  ;;  %v1316_v47 = vpack.c.bf16 %v811_v46, %v810_v45  ;;  %v1322_v4 = vpack.c.bf16 %v815_v3, %v814_v2  ;;  %v790_v46 = vld [vmem:[#allocation8 + $0x70] sm:$0xff] }
 0x19c   : > { %1279 = vmatpush1.bf16.msra.mxu0 %v1278_v16 }
 0x19d   : > { %1249 = vmatpush1.bf16.msra.mxu1 %v1248_v9  ;;  %1312 = vmatprep.subr.bf16.mxu0 %v1639_v0  ;;  %v783_v9 = vld [vmem:[#allocation8 + $0x38] sm:$0xff] }
 0x19e   : > { %1281 = vmatprep.subr.bf16.mxu1 %v1280_v41  ;;  %v823_v41 = vld [vmem:[#allocation8 + $0x178] sm:$0xff] }
 0x19f   : > { %v1334_v42 = vpack.c.bf16 %v823_v41, %v822_v40 }
 0x217   : > { %v430_v48 = vpop.xlane.xlu0 %429 }
 0x218   : > { %v431_v49 = vmul.f32 0.03125, %v430_v48  ;;  %v794_v48 = vld [vmem:[#allocation8 + $0x90] sm:$0xff] }
 0x21a   : > { %v437_v51 = vmul.f32 %v431_v49, %v431_v49  ;;  %v439_v63 = vsub.f32 %v1912_v21, %v431_v49  ;;  %v795_v49 = vld [vmem:[#allocation8 + $0x98] sm:$0xff] }
 0x21b   : > { %v435_v50 = vpop.xlane.xlu0 %434 }
 0x21c   : > { %v436_v52 = vmul.f32 0.03125, %v435_v50  ;;  %v778_v50 = vld [vmem:[#allocation8 + $0x10] sm:$0xff] }
 0x21e   : > { %v438_v53 = vsub.f32 %v436_v52, %v437_v51  ;;  %v779_v51 = vld [vmem:[#allocation8 + $0x18] sm:$0xff] }
 0x21f   : > { %v1286_v52 = vpack.c.bf16 %v779_v51, %v778_v50 }
 0x220   : > { %v440_v54 = vadd.f32 1e-05, %v438_v53  ;;  %v812_v53 = vld [vmem:[#allocation8 + $0x120] sm:$0xff] }
 0x222   : > { %1427 = vrsqrt.f32 %v440_v54  ;;  %v813_v54 = vld [vmem:[#allocation8 + $0x128] sm:$0xff] }
 0x223   : > { %v1319_v56 = vpack.c.bf16 %v813_v54, %v812_v53 }
 0x22c   : > { %v1428_v8 = vpop.eup %1427 }
 0x22d   : > { %v442_v15 = vmul.f32 %v1428_v8, %v439_v63  ;;  %v1290_v63 = vpack.c.bf16 %v781_v62, %v780_v61  ;;  %v782_v8 = vld [vmem:[#allocation8 + $0x30] sm:$0xff] }
 0x22e   : > { %v1294_v13 = vpack.c.bf16 %v783_v9, %v782_v8 }
 0x22f   : > { %v447_v17 = vmul.f32 %v446_v58, %v442_v15  ;;  %v796_v58 = vld [vmem:[#allocation8 + $0xa0] sm:$0xff]  ;;  %v817_v15 = vld [vmem:[#allocation8 + $0x148] sm:$0xff] }
 0x230   : > { %v1288_v60 = vpack.c.bf16 %v797_v59, %v796_v58 }
 0x231   : > { %v452_v21 = vadd.f32 %v451_v14, %v447_v17  ;;  %v816_v14 = vld [vmem:[#allocation8 + $0x140] sm:$0xff] }
 0x232   : > { %v1325_v16 = vpack.c.bf16 %v817_v15, %v816_v14  ;;  %v800_v17 = vld [vmem:[#allocation8 + $0xc0] sm:$0xff] }
 0x233   : > { %v491_v22 = vrot.slane %v452_v21, 2  ;;  %v483_v23 = vrot.slane %v452_v21, 1  ;;  %v475_v24 = vrot.slane %v452_v21, 7  ;;  %v467_v25 = vrot.slane %v452_v21, 6 }
 0x235   : > { %v498_v26 = vmul.f32 %v1092_v18, %v491_v22  ;;  %v490_v27 = vmul.f32 %v1091_v19, %v483_v23  ;;  %v482_v28 = vmul.f32 %v1090_v20, %v475_v24  ;;  %v474_v29 = vmul.f32 %v1089_v12, %v467_v25  ;;  %v784_v19 = vld [vmem:[#allocation8 + $0x40] sm:$0xff]  ;;  %v785_v20 = vld [vmem:[#allocation8 + $0x48] sm:$0xff]  ;;  %v818_v22 = vld [vmem:[#allocation8 + $0x150] sm:$0xff] }
 0x236   : > { %v1298_v12 = vpack.c.bf16 %v785_v20, %v784_v19  ;;  %v819_v23 = vld [vmem:[#allocation8 + $0x158] sm:$0xff]  ;;  %v802_v25 = vld [vmem:[#allocation8 + $0xd0] sm:$0xff] }
 0x237   : > { %1093 = vmatprep.mubr.msk.f32.mxu1 %vm347_vm1, %v498_v26  ;;  %1094 = vmatprep.mubr.msk.f32.mxu0 %vm347_vm1, %v498_v26  ;;  %v1328_v24 = vpack.c.bf16 %v819_v23, %v818_v22  ;;  %v803_v26 = vld [vmem:[#allocation8 + $0xd8] sm:$0xff] }
 0x238   : > { %508 = vrot.lane.b32.xlu0 %v490_v27, %s1642_s19  ;;  %500 = vrot.lane.b32.xlu1 %v482_v28, %s1643_s14  ;;  %v1300_v27 = vpack.c.bf16 %v803_v26, %v802_v25  ;;  %v786_v28 = vld [vmem:[#allocation8 + $0x50] sm:$0xff]  ;;  %s1559_s19 = sshll.u32 %s1645_s28, 4  ;;  %s1560_s19 = int_to_ptr.vmem [resolvable:$false] %s1559_s19 }
 0x239   : > { %s1561_s14 = scalar_lea.vmem %s1560_s19, 32  ;;  %p1562_p12 = scmp.lt.s32.totalorder %s1974_s11, %s1560_s19 }
 0x23a   : > { %p1563_p1 = scmp.lt.s32.totalorder %s1561_s14, %s1555_s9 }
 0x23c   : > { %504 = vrot.lane.b32.xlu1 %v452_v21, %s1644_s29  ;;  %v801_v21 = vld [vmem:[#allocation8 + $0xc8] sm:$0xff]  ;;  %p1564_p2 = por %p1563_p1, %p1562_p12 }
 0x23d   : > { %v1296_v18 = vpack.c.bf16 %v801_v21, %v800_v17 }
 0x23e   : > { %p1565_p4 = pnand %p1564_p2, %p1558_p7 }
 0x2aa   : > { %v501_v30 = vpop.permute.xlu1 %500  ;;  %v509_v33 = vpop.permute.xlu0 %508 }
 0x2ab   : > { %v511_v31 = vsel %vm347_vm1, %v474_v29, %v501_v30  ;;  %v787_v29 = vld [vmem:[#allocation8 + $0x58] sm:$0xff] }
 0x2ac   : > { %v1302_v30 = vpack.c.bf16 %v787_v29, %v786_v28 }
 0x2ae   : > { %v505_v32 = vpop.permute.xlu1 %504 }
 0x2af   : > { %v513_v34 = vsel %vm512_vm6, %v511_v31, %v505_v32  ;;  %v820_v31 = vld [vmem:[#allocation8 + $0x160] sm:$0xff]  ;;  %v821_v32 = vld [vmem:[#allocation8 + $0x168] sm:$0xff] }
 0x2b0   : > { %v515_v35 = vsel %vm514_vm7, %v513_v34, %v509_v33  ;;  %v1331_v33 = vpack.c.bf16 %v821_v32, %v820_v31  ;;  %v804_v34 = vld [vmem:[#allocation8 + $0xe0] sm:$0xff]  ;;  %v824_v32 = vld [vmem:[%s2022_s6] sm:$0x1] }
 0x2b1   : > { %661 = vmatmul.mubr.f32.vlgmr.msra.gmra.mrb[0].mxu1 %v515_v35  ;;  %732 = vmatmul.mubr.f32.vlgmr.msra.gmra.mrb[2].mxu0 %v515_v35  ;;  %v805_v35 = vld [vmem:[#allocation8 + $0xe8] sm:$0xff] }
 0x2b2   : > { %1201 = vmatprep.mubr.msk.f32.mxu0 %vm1640_vm0, %v1641_v1  ;;  %1314 = vmatpush3.bf16.msra.mxu0 %v1313_v38  ;;  %v1284_v1 = vpack.c.bf16 %v795_v49, %v794_v48  ;;  %v1304_v36 = vpack.c.bf16 %v805_v35, %v804_v34  ;;  %v789_v38 = vld [vmem:[#allocation8 + $0x68] sm:$0xff]  ;;  %v576_v49 = vld [vmem:[%s2020_s4] sm:$0x7] }
 0x2b3   : > { %1315 = vmatprep.subr.bf16.mxu0 %v1639_v0  ;;  %1283 = vmatpush3.bf16.msra.mxu1 %v1282_v44  ;;  %v1306_v39 = vpack.c.bf16 %v789_v38, %v788_v37  ;;  %v807_v44 = vld [vmem:[#allocation8 + $0xf8] sm:$0xff]  ;;  %v585_v50 = vrot.slane %v576_v49, %v445_v55 }
 0x2b4   : > { %1285 = vmatprep.subr.bf16.mxu1 %v1284_v1  ;;  %v1308_v45 = vpack.c.bf16 %v807_v44, %v806_v43  ;;  %v589_v1 = vrot.slane %v576_v49, %v450_v57 }
 0x2b6   : > { %1317 = vmatpush3.bf16.msra.mxu0 %v1316_v47  ;;  %v791_v47 = vld [vmem:[#allocation8 + $0x78] sm:$0xff] }
 0x2b7   : > { %1318 = vmatprep.subr.bf16.mxu0 %v1639_v0  ;;  %1287 = vmatpush3.bf16.msra.mxu1 %v1286_v52  ;;  %v1310_v48 = vpack.c.bf16 %v791_v47, %v790_v46 }
 0x2b8   : > { %1289 = vmatprep.subr.bf16.mxu1 %v1288_v60 }
 0x2ba   : > { %1320 = vmatpush3.bf16.msra.mxu0 %v1319_v56 }
 0x2bb   : > { %1321 = vmatprep.subr.bf16.mxu0 %v1639_v0  ;;  %1291 = vmatpush3.bf16.msra.mxu1 %v1290_v63 }
 0x2bc   : > { %1293 = vmatprep.subr.bf16.mxu1 %v1292_v7 }
 0x2be   : > { %1323 = vmatpush3.bf16.msra.mxu0 %v1322_v4 }
 0x2bf   : > { %1324 = vmatprep.subr.bf16.mxu0 %v1639_v0  ;;  %1295 = vmatpush3.bf16.msra.mxu1 %v1294_v13 }
 0x2c0   : > { %1297 = vmatprep.subr.bf16.mxu1 %v1296_v18 }
 0x2c2   : > { %1326 = vmatpush3.bf16.msra.mxu0 %v1325_v16 }
 0x2c3   : > { %1327 = vmatprep.subr.bf16.mxu0 %v1639_v0  ;;  %1299 = vmatpush3.bf16.msra.mxu1 %v1298_v12 }
 0x2c4   : > { %1301 = vmatprep.subr.bf16.mxu1 %v1300_v27 }
 0x2c6   : > { %1329 = vmatpush3.bf16.msra.mxu0 %v1328_v24 }
 0x2c7   : > { %1330 = vmatprep.subr.bf16.mxu0 %v1639_v0  ;;  %1303 = vmatpush3.bf16.msra.mxu1 %v1302_v30 }
 0x2c8   : > { %1305 = vmatprep.subr.bf16.mxu1 %v1304_v36 }
 0x2ca   : > { %1332 = vmatpush3.bf16.msra.mxu0 %v1331_v33 }
 0x2cb   : > { %1333 = vmatprep.subr.bf16.mxu0 %v1639_v0  ;;  %1307 = vmatpush3.bf16.msra.mxu1 %v1306_v39  ;;  %v581_v0 = vrot.slane %v576_v49, %v345_v11 }
 0x2cc   : > { %1309 = vmatprep.subr.bf16.mxu1 %v1308_v45 }
 0x2ce   : > { %1335 = vmatpush3.bf16.msra.mxu0 %v1334_v42 }
 0x2cf   : > { %1311 = vmatpush3.bf16.msra.mxu1 %v1310_v48 }
 0x384   : > { %v662_v51 = vpop.f32.mrb[0].mxu1  ;;  %v733_v52 = vpop.f32.mrb[2].mxu0 }
 0x385   : > { %v663_v53 = vadd.f32 %v662_v51, %v581_v0  ;;  %v734_v54 = vadd.f32 %v733_v52, %v589_v1  ;;  %v664_v56 = vpop.f32.mrb[1].mxu1  ;;  %v735_v58 = vpop.f32.mrb[3].mxu0 }
 0x386   : > { %v665_v59 = vadd.f32 %v664_v56, %v585_v50 }
 0x387   : > { %v1095_v60 = vmul.f32 -1.442695, %v663_v53  ;;  %v1097_v61 = vmul.f32 -1.442695, %v734_v54 }
 0x388   : > { %v1096_v62 = vmul.f32 -1.442695, %v665_v59 }
 0x389   : > { %1429 = vpow2.f32 %v1095_v60 }
 0x38a   : > { %1431 = vpow2.f32 %v1097_v61 }
 0x38b   : > { %1433 = vpow2.f32 %v1096_v62 }
 0x393   : > { %v1430_v11 = vpop.eup %1429 }
 0x394   : > { %v1432_v63 = vpop.eup %1431  ;;  %v746_v2 = vadd.f32 1.0, %v1430_v11 }
 0x395   : > { %v1434_v57 = vpop.eup %1433  ;;  %v748_v3 = vadd.f32 1.0, %v1432_v63 }
 0x396   : > { %1435 = vrcp.f32 %v746_v2  ;;  %v747_v10 = vadd.f32 1.0, %v1434_v57 }
 0x397   : > { %1437 = vrcp.f32 %v748_v3 }
 0x398   : > { %1439 = vrcp.f32 %v747_v10 }
 0x3a0   : > { %v1436_v55 = vpop.eup %1435 }
 0x3a1   : > { %v1438_v4 = vpop.eup %1437  ;;  %v755_v5 = vmul.f32 %v1436_v55, %v663_v53 }
 0x3a2   : > { %v1440_v6 = vpop.eup %1439  ;;  %v757_v7 = vmul.f32 %v1438_v4, %v734_v54 }
 0x3a3   : > { %v758_v8 = vrot.slane %v755_v5, 4  ;;  %v756_v9 = vmul.f32 %v1440_v6, %v665_v59 }
 0x3a4   : > { %v770_v13 = vrot.slane %v757_v7, 4 }
 0x3a5   : > { %v759_v14 = vmax.f32 %v755_v5, %v758_v8  ;;  %v764_v15 = vrot.slane %v756_v9, 4 }
 0x3a6   : > { %v771_v16 = vmax.f32 %v757_v7, %v770_v13 }
 0x3a7   : > { %v760_v17 = vrot.slane %v759_v14, 2  ;;  %v765_v21 = vmax.f32 %v756_v9, %v764_v15 }
 0x3a8   : > { %v772_v18 = vrot.slane %v771_v16, 2 }
 0x3a9   : > { %v761_v19 = vmax.f32 %v759_v14, %v760_v17  ;;  %v766_v20 = vrot.slane %v765_v21, 2 }
 0x3aa   : > { %v773_v12 = vmax.f32 %v771_v16, %v772_v18 }
 0x3ab   : > { %v767_v22 = vmax.f32 %v765_v21, %v766_v20  ;;  %v762_v23 = vrot.slane %v761_v19, 1 }
 0x3ac   : > { %v774_v24 = vrot.slane %v773_v12, 1 }
 0x3ad   : > { %v768_v25 = vrot.slane %v767_v22, 1  ;;  %v763_v28 = vmax.f32 %v761_v19, %v762_v23 }
 0x3ae   : > { %v775_v26 = vmax.f32 %v773_v12, %v774_v24 }
 0x3af   : > { %v769_v27 = vmax.f32 %v767_v22, %v768_v25 }
 0x3b0   : > { %1202 = vmatmul.mubr.f32.vlgmr.msra.gmra.mrb[4].mxu0 %v775_v26 }
 0x3b1   : > { %889 = vmatprep.mubr.f32.mxu1 %v769_v27 }
 0x3b2   : > { %890 = vmatmul.mubr.f32.vlgmr.msra.gmra.mrb[2].mxu1 %v763_v28 }
 0x483   : > { %v961_v29 = vpop.f32.mrb[4].mxu0 }
 0x484   : > { %v1203_v30 = vpop.f32.mrb[5].mxu0 }
 0x485   : > { %v1138_v31 = vpop.f32.mrb[2].mxu1 }
 0x486   : > { %v1139_v33 = vpop.f32.mrb[3].mxu1 }
 0x487   : > { %v1140_v34 = vadd.f32 %v1139_v33, %v1138_v31 }
 0x489   : > { %v892_v35 = vadd.f32 %v1140_v34, %v824_v32 }
 0x48b   : > { %v962_v36 = vadd.f32 %v961_v29, %v892_v35 }
 0x48d   : > { %965 = vst [vmem:[%s336_s23] sm:$0x1] %v962_v36 }
 0x48e   : > { %1568 = shalt.err (!%p1565_p4)
}
 0x48f   : > { %s1569_s1 = scalar_lea.hbm %s1972_s12, 16  ;;  %s1573_s17 = scalar_lea.hbm %s2023_s7, 32 }
 0x490   : > { %p1570_p0 = scmp.ne.s32.totalorder %s1972_s12, %s1569_s1  ;;  %p1574_p11 = scmp.lt.u32.totalorder %s1972_s12, %s2023_s7 }
 0x491   : > { %p1575_p13 = scmp.lt.u32.totalorder %s1573_s17, %s1569_s1  ;;  %p1577_p10 = scmp.lt.u32.totalorder %s1569_s1, %s1972_s12 }
 0x492   : > { %p1571_p9 = pnand %p1570_p0, %p1834_p5 }
 0x493   : > { %p1576_p6 = por %p1575_p13, %p1574_p11 }
 0x494   : > { %p1572_p8 = pneg %p1571_p9 }
 0x495   : > { %p1578_p3 = por %p1577_p10, %p1576_p6 }
 0x497   : > { %p1579_p7 = pnand %p1578_p3, %p1572_p8 }
 0x499   : > { %1582 = shalt.err (!%p1579_p7)
}
 0x49a   : > { %1350 = dma.vmem_to_hbm [thread:$0]  (%p1834_p5), %s1974_s11, 16, %s1972_s12, %s967_s30  }
 0x49b PF: > { %s2049_s22 = sld [smem:[#allocation15_spill]]  ;;  %s991_s23 = sand.u32 1, %s1617_s24  }
 0x49c   : > { %p2051_p1 = scmp.ge.s32.totalorder %s1629_s27, 2  ;;  %s992_s8 = scalar_lea.sflag [#allocation4], %s991_s23 }
 0x4a1   : > { %p2050_p12 = scmp.ne.s32.totalorder %s2049_s22, 0 }
 0x4a3   : > { %p1367_p2 = pnand %p2051_p1, %p2050_p12 }
 0x4a5   : > { %1612 = dma.done.wait (!%p1367_p2), %s992_s8, 16  }
 0x4a6   : > { %1614 = vsyncadd (!%p1367_p2), %s992_s8, 4294967280  ;;  %p22_p4 = scmp.ge.s32.totalorder %s1799_s21, 4   ;;  %s2052_s24 = smov %s1621_s25 }
 0x4a7   : > { %s2053_s25 = smov %s1625_s26  ;;  %s2054_s26 = smov %s1830_s13 }
 0x4a8   : > { %s2055_s27 = smov %s1799_s21  ;;  %24 = sbr.rel (!%p22_p4) target bundleno = 9 (0x9), region = 105 }
 0x4af   :  { %996 = vsyncpa [#allocation3], 1 }
 0x4b0   :  { %998 = vsyncpa [#allocation3 + $0x1], 1 }
 0x4b1   :  { %999 = vsyncpa [#allocation6], 1 }
 0x4b2   :  { %1000 = vsyncpa [#allocation9], 1 }
 0x4b3   :  { %1001 = vsyncpa [#allocation4], 1 }
 0x4b4   :  { %1003 = vsyncpa [#allocation4 + $0x1], 1 }

</bundles_post_ra>
